<compile_context>
chip_gen: v6e
topology: v6e:2x2x1
jax: 0.10.0
libtpu: 0.0.40
codegen_flags: <defaults>
</compile_context>

<pallas_src>
import jax
import jax.numpy as jnp
from jax import lax
from jax.experimental import pallas as pl
from jax.experimental.pallas import tpu as pltpu


def _layer_norm(x, gamma, beta, eps=1e-5):
    mu = jnp.mean(x, axis=-1, keepdims=True)
    var = jnp.mean((x - mu) ** 2, axis=-1, keepdims=True)
    return (x - mu) * lax.rsqrt(var + eps) * gamma + beta


def _make_encoder_kernel(*, seqs_per_chunk, seq, emb, num_heads, d_ff, compute_dtype):
    H = num_heads
    dh = emb // H
    Bc = seqs_per_chunk          # sequences handled by this grid row-chunk
    Mc = Bc * seq                # rows in the chunk
    E = emb
    in_scale = float(emb) ** 0.5
    cdt = compute_dtype

    def kernel(
        x_ref,          # (Mc, E)  f32          input rows for this chunk
        wqkv_ref,       # (1, E, 3E)  cdt       [Wq^T*inv_sqrt_dh | Wk^T | Wv^T]
        bqkv_ref,       # (1, 1, 3E)  f32
        wo_ref,         # (1, H, dh, E) cdt     head-major rows of Wo^T
        w1_ref,         # (1, E, F)  cdt
        b1_ref,         # (1, 1, F)  f32
        w2_ref,         # (1, F, E)  cdt
        pvec_ref,       # (1, 6, E)  f32        [bo, ln1_g, ln1_b, b2, ln2_g, ln2_b]
        o_ref,          # (Mc, E)  f32          carried activation / final output
    ):
        blk = pl.program_id(1)

        # Block 0: initialize the resident output block with the sqrt(E)-scaled input.
        @pl.when(blk == 0)
        def _():
            o_ref[...] = x_ref[...] * in_scale

        h = o_ref[...]                                   # (Mc, E) f32, carried in VMEM

        # Hoist small per-block params once.
        pv = pvec_ref[0]                                 # (6, E) f32
        bo, g1, be1 = pv[0:1], pv[1:2], pv[2:3]
        b2, g2, be2 = pv[3:4], pv[4:5], pv[5:6]
        bqkv = bqkv_ref[0]                               # (1, 3E) f32
        b1 = b1_ref[0]                                   # (1, F)  f32

        # ---- fused QKV projection: one (Mc, E) x (E, 3E) matmul, K = E -------------
        hx = h.astype(cdt)
        qkv = jnp.dot(hx, wqkv_ref[0],
                      preferred_element_type=jnp.float32) + bqkv      # (Mc, 3E) f32

        # ---- per-head attention; head merge fused into the output projection -------
        attn = jnp.zeros((Mc, E), jnp.float32)
        for hd in range(H):                              # short static loop over heads
            lo = hd * dh
            qh = qkv[:, lo:lo + dh].astype(cdt).reshape(Bc, seq, dh)
            kh = qkv[:, E + lo:E + lo + dh].astype(cdt).reshape(Bc, seq, dh)
            vh = qkv[:, 2 * E + lo:2 * E + lo + dh].astype(cdt).reshape(Bc, seq, dh)

            s = jnp.einsum('bqd,bkd->bqk', qh, kh,
                           preferred_element_type=jnp.float32)         # (Bc, S, S)
            s = s - jnp.max(s, axis=-1, keepdims=True)
            p = jnp.exp(s)
            p = p / jnp.sum(p, axis=-1, keepdims=True)                 # exact softmax

            ctx = jnp.einsum('bqk,bkd->bqd', p.astype(cdt), vh,
                             preferred_element_type=jnp.float32)       # (Bc, S, dh)
            ctx2 = ctx.reshape(Mc, dh).astype(cdt)
            attn = attn + jnp.dot(ctx2, wo_ref[0, hd],                 # (dh, E) slice
                                  preferred_element_type=jnp.float32)
        attn = attn + bo

        # ---- residual + LayerNorm (attention); dropout == identity (eval) ----------
        h1 = _layer_norm(h + attn, g1, be1)

        # ---- feed-forward: Linear -> ReLU -> Linear (K = E, K = F contractions) ----
        f = jnp.dot(h1.astype(cdt), w1_ref[0], preferred_element_type=jnp.float32) + b1
        f = jnp.maximum(f, 0.0)
        f = jnp.dot(f.astype(cdt), w2_ref[0], preferred_element_type=jnp.float32) + b2

        # ---- residual + LayerNorm (feed-forward) ------------------------------------
        h2 = _layer_norm(h1 + f, g2, be2)

        # Carry to next encoder block (resident); HBM writeback only when chunk ends.
        o_ref[...] = h2

    return kernel


def encoder_forward(x, stacked, *, num_heads, compute_dtype=jnp.bfloat16,
                    seqs_per_chunk=1):
    """Full fused Encoder forward. x: (B, S, E) float32 -> (B, S, E) float32."""
    B, S, E = x.shape
    NB = stacked["wqkv"].shape[0]
    F = stacked["w1"].shape[-1]
    assert E % num_heads == 0
    assert B % seqs_per_chunk == 0
    Bc = seqs_per_chunk
    Mc = Bc * S
    n_chunks = B // Bc
    M = B * S

    kernel = _make_encoder_kernel(seqs_per_chunk=Bc, seq=S, emb=E,
                                  num_heads=num_heads, d_ff=F,
                                  compute_dtype=compute_dtype)

    order = ["wqkv", "bqkv", "wo", "w1", "b1", "w2", "pvec"]
    weights = [stacked[n] for n in order]

    def wspec(arr):
        trailing = tuple(arr.shape[1:])
        zeros = (0,) * len(trailing)
        return pl.BlockSpec((1,) + trailing, lambda m, b, _z=zeros: (b,) + _z)

    in_specs = [pl.BlockSpec((Mc, E), lambda m, b: (m, 0))]
    in_specs += [wspec(w) for w in weights]

    out = pl.pallas_call(
        kernel,
        out_shape=jax.ShapeDtypeStruct((M, E), jnp.float32),
        grid_spec=pltpu.PrefetchScalarGridSpec(
            num_scalar_prefetch=0,
            grid=(n_chunks, NB),                 # rows parallel, blocks sequential
            in_specs=in_specs,
            out_specs=pl.BlockSpec((Mc, E), lambda m, b: (m, 0)),
        ),
        compiler_params=pltpu.CompilerParams(
            dimension_semantics=("parallel", "arbitrary"),
            vmem_limit_bytes=64 * 1024 * 1024,
        ),
    )(x.reshape(M, E).astype(jnp.float32), *weights)
    return out.reshape(B, S, E)


def prepare_stacked_params(raw_params, *, num_heads, compute_dtype=jnp.bfloat16):
    """Rearrange PyTorch-layout per-block params into block-stacked kernel arrays."""
    E = raw_params[0]["wq"].shape[0]
    F = raw_params[0]["w1"].shape[0]
    H = num_heads
    dh = E // H
    scale = 1.0 / (float(dh) ** 0.5)        # folded into Wq / bq

    def per_block(p):
        wqkv = jnp.concatenate([p["wq"].T * scale, p["wk"].T, p["wv"].T], axis=1)  # (E, 3E)
        bqkv = jnp.concatenate([p["bq"] * scale, p["bk"], p["bv"]]).reshape(1, 3 * E)
        wo = p["wo"].T.reshape(H, dh, E)                                            # head-major
        pvec = jnp.stack([p["bo"], p["ln1_g"], p["ln1_b"],
                          p["b2"], p["ln2_g"], p["ln2_b"]])                         # (6, E)
        return (wqkv, bqkv, wo, p["w1"].T, p["b1"].reshape(1, F), p["w2"].T, pvec)

    blocks = [per_block(p) for p in raw_params]
    stack = lambda i, dt: jnp.stack([b[i] for b in blocks]).astype(dt)
    return {
        "wqkv": stack(0, compute_dtype),
        "bqkv": stack(1, jnp.float32),
        "wo":   stack(2, compute_dtype),
        "w1":   stack(3, compute_dtype),
        "b1":   stack(4, jnp.float32),
        "w2":   stack(5, compute_dtype),
        "pvec": stack(6, jnp.float32),
    }


def init_params(key, num_blocks, embedding_size, d_ff):
    """Deterministic synthetic parameters mirroring the PyTorch module's shapes."""
    E, F = embedding_size, d_ff
    block_params = []
    for i in range(num_blocks):
        k = jax.random.fold_in(key, i)
        ks = jax.random.split(k, 8)
        in_proj_w = 0.05 * jax.random.normal(ks[0], (3 * E, E), jnp.float32)
        in_proj_b = 0.05 * jax.random.normal(ks[1], (3 * E,), jnp.float32)
        wo = 0.05 * jax.random.normal(ks[2], (E, E), jnp.float32)
        bo = 0.05 * jax.random.normal(ks[3], (E,), jnp.float32)
        w1 = 0.05 * jax.random.normal(ks[4], (F, E), jnp.float32)
        b1 = 0.05 * jax.random.normal(ks[5], (F,), jnp.float32)
        w2 = 0.05 * jax.random.normal(ks[6], (E, F), jnp.float32)
        b2 = 0.05 * jax.random.normal(ks[7], (E,), jnp.float32)
        block_params.append({
            "wq": in_proj_w[0 * E:1 * E], "wk": in_proj_w[1 * E:2 * E], "wv": in_proj_w[2 * E:3 * E],
            "bq": in_proj_b[0 * E:1 * E], "bk": in_proj_b[1 * E:2 * E], "bv": in_proj_b[2 * E:3 * E],
            "wo": wo, "bo": bo,
            "ln1_g": jnp.ones((E,), jnp.float32), "ln1_b": jnp.zeros((E,), jnp.float32),
            "w1": w1, "b1": b1, "w2": w2, "b2": b2,
            "ln2_g": jnp.ones((E,), jnp.float32), "ln2_b": jnp.zeros((E,), jnp.float32),
        })
    return block_params


def _ln_ref(x, g, b, eps=1e-5):
    mu = jnp.mean(x, axis=-1, keepdims=True)
    var = jnp.mean((x - mu) ** 2, axis=-1, keepdims=True)
    return (x - mu) / jnp.sqrt(var + eps) * g + b


def encoder_reference(x, raw_params, *, num_heads):
    """Pure-JAX f32 reference matching the PyTorch module in eval mode."""
    B, S, E = x.shape
    H, dh = num_heads, E // num_heads
    enc = x * (float(E) ** 0.5)
    for p in raw_params:
        q = enc @ p["wq"].T + p["bq"]
        k = enc @ p["wk"].T + p["bk"]
        v = enc @ p["wv"].T + p["bv"]
        split = lambda t: t.reshape(B, S, H, dh).transpose(0, 2, 1, 3)
        qh, kh, vh = split(q), split(k), split(v)
        s = jnp.einsum('bhqd,bhkd->bhqk', qh, kh) / jnp.sqrt(float(dh))
        w = jax.nn.softmax(s, axis=-1)
        ctx = jnp.einsum('bhqk,bhkd->bhqd', w, vh).transpose(0, 2, 1, 3).reshape(B, S, E)
        attn = ctx @ p["wo"].T + p["bo"]
        enc = _ln_ref(enc + attn, p["ln1_g"], p["ln1_b"])
        ff = jnp.maximum(enc @ p["w1"].T + p["b1"], 0.0) @ p["w2"].T + p["b2"]
        enc = _ln_ref(enc + ff, p["ln2_g"], p["ln2_b"])
    return enc


if __name__ == "__main__":
    # Shapes consistent with the module: input [batch_size, num_neighbors, embedding_size]
    batch_size = 2
    num_neighbors = 8
    embedding_size = 32
    num_blocks = 2
    num_heads = 4
    d_ff = 64

    key = jax.random.PRNGKey(0)
    k_x, k_p = jax.random.split(key)
    x = jax.random.normal(k_x, (batch_size, num_neighbors, embedding_size), jnp.float32)

    raw_params = init_params(k_p, num_blocks, embedding_size, d_ff)
    stacked = prepare_stacked_params(raw_params, num_heads=num_heads,
                                     compute_dtype=jnp.bfloat16)

    out = encoder_forward(x, stacked, num_heads=num_heads,
                          compute_dtype=jnp.bfloat16, seqs_per_chunk=1)
    out = jax.block_until_ready(out)

    assert out.shape == (batch_size, num_neighbors, embedding_size)
    assert bool(jnp.all(jnp.isfinite(out)))

    # bf16 matmul operands with f32 accumulation; softmax / LN are exact f32.
    ref = encoder_reference(x, raw_params, num_heads=num_heads)
    max_err = float(jnp.max(jnp.abs(out - ref)))
    assert max_err < 0.15, f"max abs err vs f32 reference: {max_err}"

    print("KERNEL_OK")
</pallas_src>

<mosaic_0001>
module attributes {stable_mosaic.version = 11 : i64} {
  func.func @kernel(%arg0: i32, %arg1: i32, %arg2: memref<8x32xf32, #tpu.memory_space<vmem>>, %arg3: memref<1x32x96xbf16, #tpu.memory_space<vmem>>, %arg4: memref<1x1x96xf32, #tpu.memory_space<vmem>>, %arg5: memref<1x4x8x32xbf16, #tpu.memory_space<vmem>>, %arg6: memref<1x32x64xbf16, #tpu.memory_space<vmem>>, %arg7: memref<1x1x64xf32, #tpu.memory_space<vmem>>, %arg8: memref<1x64x32xbf16, #tpu.memory_space<vmem>>, %arg9: memref<1x6x32xf32, #tpu.memory_space<vmem>>, %arg10: memref<8x32xf32, #tpu.memory_space<vmem>>) attributes {dimension_semantics = [#tpu.dimension_semantics<parallel>, #tpu.dimension_semantics<arbitrary>], iteration_bounds = array<i64: 2, 2>, scalar_prefetch = 0 : i64, scratch_operands = 0 : i64, tpu.core_type = #tpu.core_type<tc>, window_params = [{transform_indices = @transform_0, window_bounds = array<i64: 8, 32>}, {transform_indices = @transform_1, window_bounds = array<i64: 1, 32, 96>}, {transform_indices = @transform_2, window_bounds = array<i64: 1, 1, 96>}, {transform_indices = @transform_3, window_bounds = array<i64: 1, 4, 8, 32>}, {transform_indices = @transform_4, window_bounds = array<i64: 1, 32, 64>}, {transform_indices = @transform_5, window_bounds = array<i64: 1, 1, 64>}, {transform_indices = @transform_6, window_bounds = array<i64: 1, 64, 32>}, {transform_indices = @transform_7, window_bounds = array<i64: 1, 6, 32>}, {transform_indices = @transform_8, window_bounds = array<i64: 8, 32>}]} {
    %c0_i32 = arith.constant 0 : i32
    %0 = arith.cmpi eq, %arg1, %c0_i32 : i32
    %1 = arith.extui %0 : i1 to i32
    %c0_i32_0 = arith.constant 0 : i32
    %2 = arith.cmpi ne, %1, %c0_i32_0 : i32
    scf.if %2 {
      %c0_69 = arith.constant 0 : index
      %c0_70 = arith.constant 0 : index
      %194 = vector.load %arg2[%c0_69, %c0_70] : memref<8x32xf32, #tpu.memory_space<vmem>>, vector<8x32xf32>
      %cst_71 = arith.constant 5.65685415 : f32
      %195 = vector.broadcast %cst_71 : f32 to vector<8x32xf32>
      %196 = arith.mulf %194, %195 : vector<8x32xf32>
      %c0_72 = arith.constant 0 : index
      %c0_73 = arith.constant 0 : index
      %197 = vector.load %arg10[%c0_72, %c0_73] : memref<8x32xf32, #tpu.memory_space<vmem>>, vector<8x32xf32>
      tpu.vector_store %arg10[%c0_72, %c0_73], %196 {strides = array<i32>} : memref<8x32xf32, #tpu.memory_space<vmem>>, vector<8x32xf32>,
    } else {
    }
    %c0 = arith.constant 0 : index
    %c0_1 = arith.constant 0 : index
    %3 = vector.load %arg10[%c0, %c0_1] : memref<8x32xf32, #tpu.memory_space<vmem>>, vector<8x32xf32>
    %c0_2 = arith.constant 0 : index
    %c0_3 = arith.constant 0 : index
    %c0_4 = arith.constant 0 : index
    %4 = vector.load %arg9[%c0_2, %c0_3, %c0_4] : memref<1x6x32xf32, #tpu.memory_space<vmem>>, vector<1x6x32xf32>
    %5 = vector.shape_cast %4 : vector<1x6x32xf32> to vector<6x32xf32>
    %6 = vector.extract_strided_slice %5 {offsets = [0, 0], sizes = [1, 32], strides = [1, 1]} : vector<6x32xf32> to vector<1x32xf32>
    %7 = vector.extract_strided_slice %5 {offsets = [1, 0], sizes = [1, 32], strides = [1, 1]} : vector<6x32xf32> to vector<1x32xf32>
    %8 = vector.extract_strided_slice %5 {offsets = [2, 0], sizes = [1, 32], strides = [1, 1]} : vector<6x32xf32> to vector<1x32xf32>
    %9 = vector.extract_strided_slice %5 {offsets = [3, 0], sizes = [1, 32], strides = [1, 1]} : vector<6x32xf32> to vector<1x32xf32>
    %10 = vector.extract_strided_slice %5 {offsets = [4, 0], sizes = [1, 32], strides = [1, 1]} : vector<6x32xf32> to vector<1x32xf32>
    %11 = vector.extract_strided_slice %5 {offsets = [5, 0], sizes = [1, 32], strides = [1, 1]} : vector<6x32xf32> to vector<1x32xf32>
    %c0_5 = arith.constant 0 : index
    %c0_6 = arith.constant 0 : index
    %c0_7 = arith.constant 0 : index
    %12 = vector.load %arg4[%c0_5, %c0_6, %c0_7] : memref<1x1x96xf32, #tpu.memory_space<vmem>>, vector<1x1x96xf32>
    %13 = vector.shape_cast %12 : vector<1x1x96xf32> to vector<1x96xf32>
    %c0_8 = arith.constant 0 : index
    %c0_9 = arith.constant 0 : index
    %c0_10 = arith.constant 0 : index
    %14 = vector.load %arg7[%c0_8, %c0_9, %c0_10] : memref<1x1x64xf32, #tpu.memory_space<vmem>>, vector<1x1x64xf32>
    %15 = vector.shape_cast %14 : vector<1x1x64xf32> to vector<1x64xf32>
    %16 = arith.truncf %3 : vector<8x32xf32> to vector<8x32xbf16>
    %c0_11 = arith.constant 0 : index
    %c0_12 = arith.constant 0 : index
    %c0_13 = arith.constant 0 : index
    %17 = vector.load %arg3[%c0_11, %c0_12, %c0_13] : memref<1x32x96xbf16, #tpu.memory_space<vmem>>, vector<1x32x96xbf16>
    %18 = vector.shape_cast %17 : vector<1x32x96xbf16> to vector<32x96xbf16>
    %cst = arith.constant dense<0.000000e+00> : vector<8x96xf32>
    %19 = tpu.matmul %16, %18, %cst {dimension_numbers = #tpu.dot_dimension_numbers<[1], [0], [0], [1], [0, 0, 1, 1], [], []>} : vector<8x32xbf16>, vector<32x96xbf16>, vector<8x96xf32> -> vector<8x96xf32>
    %20 = vector.broadcast %13 : vector<1x96xf32> to vector<8x96xf32>
    %21 = arith.addf %19, %20 : vector<8x96xf32>
    %cst_14 = arith.constant 0.000000e+00 : f32
    %22 = vector.broadcast %cst_14 : f32 to vector<8x32xf32>
    %23 = vector.extract_strided_slice %21 {offsets = [0, 0], sizes = [8, 8], strides = [1, 1]} : vector<8x96xf32> to vector<8x8xf32>
    %24 = arith.truncf %23 : vector<8x8xf32> to vector<8x8xbf16>
    %25 = vector.shape_cast %24 : vector<8x8xbf16> to vector<1x8x8xbf16>
    %26 = vector.extract_strided_slice %21 {offsets = [0, 32], sizes = [8, 8], strides = [1, 1]} : vector<8x96xf32> to vector<8x8xf32>
    %27 = arith.truncf %26 : vector<8x8xf32> to vector<8x8xbf16>
    %28 = vector.shape_cast %27 : vector<8x8xbf16> to vector<1x8x8xbf16>
    %29 = vector.extract_strided_slice %21 {offsets = [0, 64], sizes = [8, 8], strides = [1, 1]} : vector<8x96xf32> to vector<8x8xf32>
    %30 = arith.truncf %29 : vector<8x8xf32> to vector<8x8xbf16>
    %31 = vector.shape_cast %30 : vector<8x8xbf16> to vector<1x8x8xbf16>
    "tpu.trace_start"() <{level = 10 : i32, message = "bqd,bkd->bqk"}> : () -> ()
    %cst_15 = arith.constant dense<0.000000e+00> : vector<1x8x8xf32>
    %32 = tpu.matmul %25, %28, %cst_15 {dimension_numbers = #tpu.dot_dimension_numbers<[2], [2], [1], [1], [0, 0, 0, 1, 1, 1], [0], [0]>} : vector<1x8x8xbf16>, vector<1x8x8xbf16>, vector<1x8x8xf32> -> vector<1x8x8xf32>
    "tpu.trace_stop"() : () -> ()
    %cst_16 = arith.constant dense<0xFF800000> : vector<1x8xf32>
    %33 = vector.multi_reduction <maximumf>, %32, %cst_16 [2] : vector<1x8x8xf32> to vector<1x8xf32>
    %34 = vector.shape_cast %33 : vector<1x8xf32> to vector<1x8x1xf32>
    %35 = vector.broadcast %34 : vector<1x8x1xf32> to vector<1x8x8xf32>
    %36 = arith.subf %32, %35 : vector<1x8x8xf32>
    %37 = math.exp %36 : vector<1x8x8xf32>
    %cst_17 = arith.constant dense<0.000000e+00> : vector<1x8xf32>
    %38 = vector.multi_reduction <add>, %37, %cst_17 [2] : vector<1x8x8xf32> to vector<1x8xf32>
    %39 = vector.shape_cast %38 : vector<1x8xf32> to vector<1x8x1xf32>
    %40 = vector.broadcast %39 : vector<1x8x1xf32> to vector<1x8x8xf32>
    %41 = arith.divf %37, %40 : vector<1x8x8xf32>
    %42 = arith.truncf %41 : vector<1x8x8xf32> to vector<1x8x8xbf16>
    "tpu.trace_start"() <{level = 10 : i32, message = "bqk,bkd->bqd"}> : () -> ()
    %cst_18 = arith.constant dense<0.000000e+00> : vector<1x8x8xf32>
    %43 = tpu.matmul %42, %31, %cst_18 {dimension_numbers = #tpu.dot_dimension_numbers<[2], [1], [1], [2], [0, 0, 0, 1, 1, 2], [0], [0]>} : vector<1x8x8xbf16>, vector<1x8x8xbf16>, vector<1x8x8xf32> -> vector<1x8x8xf32>
    "tpu.trace_stop"() : () -> ()
    %44 = vector.shape_cast %43 : vector<1x8x8xf32> to vector<8x8xf32>
    %45 = arith.truncf %44 : vector<8x8xf32> to vector<8x8xbf16>
    %c0_19 = arith.constant 0 : index
    %c0_20 = arith.constant 0 : index
    %c0_21 = arith.constant 0 : index
    %c0_22 = arith.constant 0 : index
    %46 = vector.load %arg5[%c0_19, %c0_20, %c0_21, %c0_22] : memref<1x4x8x32xbf16, #tpu.memory_space<vmem>>, vector<1x1x8x32xbf16>
    %47 = vector.shape_cast %46 : vector<1x1x8x32xbf16> to vector<8x32xbf16>
    %cst_23 = arith.constant dense<0.000000e+00> : vector<8x32xf32>
    %48 = tpu.matmul %45, %47, %cst_23 {dimension_numbers = #tpu.dot_dimension_numbers<[1], [0], [0], [1], [0, 0, 1, 1], [], []>} : vector<8x8xbf16>, vector<8x32xbf16>, vector<8x32xf32> -> vector<8x32xf32>
    %49 = arith.addf %22, %48 : vector<8x32xf32>
    %50 = vector.extract_strided_slice %21 {offsets = [0, 8], sizes = [8, 8], strides = [1, 1]} : vector<8x96xf32> to vector<8x8xf32>
    %51 = arith.truncf %50 : vector<8x8xf32> to vector<8x8xbf16>
    %52 = vector.shape_cast %51 : vector<8x8xbf16> to vector<1x8x8xbf16>
    %53 = vector.extract_strided_slice %21 {offsets = [0, 40], sizes = [8, 8], strides = [1, 1]} : vector<8x96xf32> to vector<8x8xf32>
    %54 = arith.truncf %53 : vector<8x8xf32> to vector<8x8xbf16>
    %55 = vector.shape_cast %54 : vector<8x8xbf16> to vector<1x8x8xbf16>
    %56 = vector.extract_strided_slice %21 {offsets = [0, 72], sizes = [8, 8], strides = [1, 1]} : vector<8x96xf32> to vector<8x8xf32>
    %57 = arith.truncf %56 : vector<8x8xf32> to vector<8x8xbf16>
    %58 = vector.shape_cast %57 : vector<8x8xbf16> to vector<1x8x8xbf16>
    "tpu.trace_start"() <{level = 10 : i32, message = "bqd,bkd->bqk"}> : () -> ()
    %cst_24 = arith.constant dense<0.000000e+00> : vector<1x8x8xf32>
    %59 = tpu.matmul %52, %55, %cst_24 {dimension_numbers = #tpu.dot_dimension_numbers<[2], [2], [1], [1], [0, 0, 0, 1, 1, 1], [0], [0]>} : vector<1x8x8xbf16>, vector<1x8x8xbf16>, vector<1x8x8xf32> -> vector<1x8x8xf32>
    "tpu.trace_stop"() : () -> ()
    %cst_25 = arith.constant dense<0xFF800000> : vector<1x8xf32>
    %60 = vector.multi_reduction <maximumf>, %59, %cst_25 [2] : vector<1x8x8xf32> to vector<1x8xf32>
    %61 = vector.shape_cast %60 : vector<1x8xf32> to vector<1x8x1xf32>
    %62 = vector.broadcast %61 : vector<1x8x1xf32> to vector<1x8x8xf32>
    %63 = arith.subf %59, %62 : vector<1x8x8xf32>
    %64 = math.exp %63 : vector<1x8x8xf32>
    %cst_26 = arith.constant dense<0.000000e+00> : vector<1x8xf32>
    %65 = vector.multi_reduction <add>, %64, %cst_26 [2] : vector<1x8x8xf32> to vector<1x8xf32>
    %66 = vector.shape_cast %65 : vector<1x8xf32> to vector<1x8x1xf32>
    %67 = vector.broadcast %66 : vector<1x8x1xf32> to vector<1x8x8xf32>
    %68 = arith.divf %64, %67 : vector<1x8x8xf32>
    %69 = arith.truncf %68 : vector<1x8x8xf32> to vector<1x8x8xbf16>
    "tpu.trace_start"() <{level = 10 : i32, message = "bqk,bkd->bqd"}> : () -> ()
    %cst_27 = arith.constant dense<0.000000e+00> : vector<1x8x8xf32>
    %70 = tpu.matmul %69, %58, %cst_27 {dimension_numbers = #tpu.dot_dimension_numbers<[2], [1], [1], [2], [0, 0, 0, 1, 1, 2], [0], [0]>} : vector<1x8x8xbf16>, vector<1x8x8xbf16>, vector<1x8x8xf32> -> vector<1x8x8xf32>
    "tpu.trace_stop"() : () -> ()
    %71 = vector.shape_cast %70 : vector<1x8x8xf32> to vector<8x8xf32>
    %72 = arith.truncf %71 : vector<8x8xf32> to vector<8x8xbf16>
    %c0_28 = arith.constant 0 : index
    %c1 = arith.constant 1 : index
    %c0_29 = arith.constant 0 : index
    %c0_30 = arith.constant 0 : index
    %73 = vector.load %arg5[%c0_28, %c1, %c0_29, %c0_30] : memref<1x4x8x32xbf16, #tpu.memory_space<vmem>>, vector<1x1x8x32xbf16>
    %74 = vector.shape_cast %73 : vector<1x1x8x32xbf16> to vector<8x32xbf16>
    %cst_31 = arith.constant dense<0.000000e+00> : vector<8x32xf32>
    %75 = tpu.matmul %72, %74, %cst_31 {dimension_numbers = #tpu.dot_dimension_numbers<[1], [0], [0], [1], [0, 0, 1, 1], [], []>} : vector<8x8xbf16>, vector<8x32xbf16>, vector<8x32xf32> -> vector<8x32xf32>
    %76 = arith.addf %49, %75 : vector<8x32xf32>
    %77 = vector.extract_strided_slice %21 {offsets = [0, 16], sizes = [8, 8], strides = [1, 1]} : vector<8x96xf32> to vector<8x8xf32>
    %78 = arith.truncf %77 : vector<8x8xf32> to vector<8x8xbf16>
    %79 = vector.shape_cast %78 : vector<8x8xbf16> to vector<1x8x8xbf16>
    %80 = vector.extract_strided_slice %21 {offsets = [0, 48], sizes = [8, 8], strides = [1, 1]} : vector<8x96xf32> to vector<8x8xf32>
    %81 = arith.truncf %80 : vector<8x8xf32> to vector<8x8xbf16>
    %82 = vector.shape_cast %81 : vector<8x8xbf16> to vector<1x8x8xbf16>
    %83 = vector.extract_strided_slice %21 {offsets = [0, 80], sizes = [8, 8], strides = [1, 1]} : vector<8x96xf32> to vector<8x8xf32>
    %84 = arith.truncf %83 : vector<8x8xf32> to vector<8x8xbf16>
    %85 = vector.shape_cast %84 : vector<8x8xbf16> to vector<1x8x8xbf16>
    "tpu.trace_start"() <{level = 10 : i32, message = "bqd,bkd->bqk"}> : () -> ()
    %cst_32 = arith.constant dense<0.000000e+00> : vector<1x8x8xf32>
    %86 = tpu.matmul %79, %82, %cst_32 {dimension_numbers = #tpu.dot_dimension_numbers<[2], [2], [1], [1], [0, 0, 0, 1, 1, 1], [0], [0]>} : vector<1x8x8xbf16>, vector<1x8x8xbf16>, vector<1x8x8xf32> -> vector<1x8x8xf32>
    "tpu.trace_stop"() : () -> ()
    %cst_33 = arith.constant dense<0xFF800000> : vector<1x8xf32>
    %87 = vector.multi_reduction <maximumf>, %86, %cst_33 [2] : vector<1x8x8xf32> to vector<1x8xf32>
    %88 = vector.shape_cast %87 : vector<1x8xf32> to vector<1x8x1xf32>
    %89 = vector.broadcast %88 : vector<1x8x1xf32> to vector<1x8x8xf32>
    %90 = arith.subf %86, %89 : vector<1x8x8xf32>
    %91 = math.exp %90 : vector<1x8x8xf32>
    %cst_34 = arith.constant dense<0.000000e+00> : vector<1x8xf32>
    %92 = vector.multi_reduction <add>, %91, %cst_34 [2] : vector<1x8x8xf32> to vector<1x8xf32>
    %93 = vector.shape_cast %92 : vector<1x8xf32> to vector<1x8x1xf32>
    %94 = vector.broadcast %93 : vector<1x8x1xf32> to vector<1x8x8xf32>
    %95 = arith.divf %91, %94 : vector<1x8x8xf32>
    %96 = arith.truncf %95 : vector<1x8x8xf32> to vector<1x8x8xbf16>
    "tpu.trace_start"() <{level = 10 : i32, message = "bqk,bkd->bqd"}> : () -> ()
    %cst_35 = arith.constant dense<0.000000e+00> : vector<1x8x8xf32>
    %97 = tpu.matmul %96, %85, %cst_35 {dimension_numbers = #tpu.dot_dimension_numbers<[2], [1], [1], [2], [0, 0, 0, 1, 1, 2], [0], [0]>} : vector<1x8x8xbf16>, vector<1x8x8xbf16>, vector<1x8x8xf32> -> vector<1x8x8xf32>
    "tpu.trace_stop"() : () -> ()
    %98 = vector.shape_cast %97 : vector<1x8x8xf32> to vector<8x8xf32>
    %99 = arith.truncf %98 : vector<8x8xf32> to vector<8x8xbf16>
    %c0_36 = arith.constant 0 : index
    %c2 = arith.constant 2 : index
    %c0_37 = arith.constant 0 : index
    %c0_38 = arith.constant 0 : index
    %100 = vector.load %arg5[%c0_36, %c2, %c0_37, %c0_38] : memref<1x4x8x32xbf16, #tpu.memory_space<vmem>>, vector<1x1x8x32xbf16>
    %101 = vector.shape_cast %100 : vector<1x1x8x32xbf16> to vector<8x32xbf16>
    %cst_39 = arith.constant dense<0.000000e+00> : vector<8x32xf32>
    %102 = tpu.matmul %99, %101, %cst_39 {dimension_numbers = #tpu.dot_dimension_numbers<[1], [0], [0], [1], [0, 0, 1, 1], [], []>} : vector<8x8xbf16>, vector<8x32xbf16>, vector<8x32xf32> -> vector<8x32xf32>
    %103 = arith.addf %76, %102 : vector<8x32xf32>
    %104 = vector.extract_strided_slice %21 {offsets = [0, 24], sizes = [8, 8], strides = [1, 1]} : vector<8x96xf32> to vector<8x8xf32>
    %105 = arith.truncf %104 : vector<8x8xf32> to vector<8x8xbf16>
    %106 = vector.shape_cast %105 : vector<8x8xbf16> to vector<1x8x8xbf16>
    %107 = vector.extract_strided_slice %21 {offsets = [0, 56], sizes = [8, 8], strides = [1, 1]} : vector<8x96xf32> to vector<8x8xf32>
    %108 = arith.truncf %107 : vector<8x8xf32> to vector<8x8xbf16>
    %109 = vector.shape_cast %108 : vector<8x8xbf16> to vector<1x8x8xbf16>
    %110 = vector.extract_strided_slice %21 {offsets = [0, 88], sizes = [8, 8], strides = [1, 1]} : vector<8x96xf32> to vector<8x8xf32>
    %111 = arith.truncf %110 : vector<8x8xf32> to vector<8x8xbf16>
    %112 = vector.shape_cast %111 : vector<8x8xbf16> to vector<1x8x8xbf16>
    "tpu.trace_start"() <{level = 10 : i32, message = "bqd,bkd->bqk"}> : () -> ()
    %cst_40 = arith.constant dense<0.000000e+00> : vector<1x8x8xf32>
    %113 = tpu.matmul %106, %109, %cst_40 {dimension_numbers = #tpu.dot_dimension_numbers<[2], [2], [1], [1], [0, 0, 0, 1, 1, 1], [0], [0]>} : vector<1x8x8xbf16>, vector<1x8x8xbf16>, vector<1x8x8xf32> -> vector<1x8x8xf32>
    "tpu.trace_stop"() : () -> ()
    %cst_41 = arith.constant dense<0xFF800000> : vector<1x8xf32>
    %114 = vector.multi_reduction <maximumf>, %113, %cst_41 [2] : vector<1x8x8xf32> to vector<1x8xf32>
    %115 = vector.shape_cast %114 : vector<1x8xf32> to vector<1x8x1xf32>
    %116 = vector.broadcast %115 : vector<1x8x1xf32> to vector<1x8x8xf32>
    %117 = arith.subf %113, %116 : vector<1x8x8xf32>
    %118 = math.exp %117 : vector<1x8x8xf32>
    %cst_42 = arith.constant dense<0.000000e+00> : vector<1x8xf32>
    %119 = vector.multi_reduction <add>, %118, %cst_42 [2] : vector<1x8x8xf32> to vector<1x8xf32>
    %120 = vector.shape_cast %119 : vector<1x8xf32> to vector<1x8x1xf32>
    %121 = vector.broadcast %120 : vector<1x8x1xf32> to vector<1x8x8xf32>
    %122 = arith.divf %118, %121 : vector<1x8x8xf32>
    %123 = arith.truncf %122 : vector<1x8x8xf32> to vector<1x8x8xbf16>
    "tpu.trace_start"() <{level = 10 : i32, message = "bqk,bkd->bqd"}> : () -> ()
    %cst_43 = arith.constant dense<0.000000e+00> : vector<1x8x8xf32>
    %124 = tpu.matmul %123, %112, %cst_43 {dimension_numbers = #tpu.dot_dimension_numbers<[2], [1], [1], [2], [0, 0, 0, 1, 1, 2], [0], [0]>} : vector<1x8x8xbf16>, vector<1x8x8xbf16>, vector<1x8x8xf32> -> vector<1x8x8xf32>
    "tpu.trace_stop"() : () -> ()
    %125 = vector.shape_cast %124 : vector<1x8x8xf32> to vector<8x8xf32>
    %126 = arith.truncf %125 : vector<8x8xf32> to vector<8x8xbf16>
    %c0_44 = arith.constant 0 : index
    %c3 = arith.constant 3 : index
    %c0_45 = arith.constant 0 : index
    %c0_46 = arith.constant 0 : index
    %127 = vector.load %arg5[%c0_44, %c3, %c0_45, %c0_46] : memref<1x4x8x32xbf16, #tpu.memory_space<vmem>>, vector<1x1x8x32xbf16>
    %128 = vector.shape_cast %127 : vector<1x1x8x32xbf16> to vector<8x32xbf16>
    %cst_47 = arith.constant dense<0.000000e+00> : vector<8x32xf32>
    %129 = tpu.matmul %126, %128, %cst_47 {dimension_numbers = #tpu.dot_dimension_numbers<[1], [0], [0], [1], [0, 0, 1, 1], [], []>} : vector<8x8xbf16>, vector<8x32xbf16>, vector<8x32xf32> -> vector<8x32xf32>
    %130 = arith.addf %103, %129 : vector<8x32xf32>
    %131 = vector.broadcast %6 : vector<1x32xf32> to vector<8x32xf32>
    %132 = arith.addf %130, %131 : vector<8x32xf32>
    %133 = arith.addf %3, %132 : vector<8x32xf32>
    %cst_48 = arith.constant dense<0.000000e+00> : vector<8xf32>
    %134 = vector.multi_reduction <add>, %133, %cst_48 [1] : vector<8x32xf32> to vector<8xf32>
    %135 = vector.shape_cast %134 : vector<8xf32> to vector<8x1xf32>
    %cst_49 = arith.constant 3.200000e+01 : f32
    %136 = vector.broadcast %cst_49 : f32 to vector<8x1xf32>
    %137 = arith.divf %135, %136 : vector<8x1xf32>
    %138 = vector.broadcast %137 : vector<8x1xf32> to vector<8x32xf32>
    %139 = arith.subf %133, %138 : vector<8x32xf32>
    %140 = arith.mulf %139, %139 : vector<8x32xf32>
    %cst_50 = arith.constant dense<0.000000e+00> : vector<8xf32>
    %141 = vector.multi_reduction <add>, %140, %cst_50 [1] : vector<8x32xf32> to vector<8xf32>
    %142 = vector.shape_cast %141 : vector<8xf32> to vector<8x1xf32>
    %cst_51 = arith.constant 3.200000e+01 : f32
    %143 = vector.broadcast %cst_51 : f32 to vector<8x1xf32>
    %144 = arith.divf %142, %143 : vector<8x1xf32>
    %145 = vector.broadcast %137 : vector<8x1xf32> to vector<8x32xf32>
    %146 = arith.subf %133, %145 : vector<8x32xf32>
    %cst_52 = arith.constant 9.99999974E-6 : f32
    %147 = vector.broadcast %cst_52 : f32 to vector<8x1xf32>
    %148 = arith.addf %144, %147 : vector<8x1xf32>
    %149 = math.rsqrt %148 : vector<8x1xf32>
    %150 = vector.broadcast %149 : vector<8x1xf32> to vector<8x32xf32>
    %151 = arith.mulf %146, %150 : vector<8x32xf32>
    %152 = vector.broadcast %7 : vector<1x32xf32> to vector<8x32xf32>
    %153 = arith.mulf %151, %152 : vector<8x32xf32>
    %154 = vector.broadcast %8 : vector<1x32xf32> to vector<8x32xf32>
    %155 = arith.addf %153, %154 : vector<8x32xf32>
    %156 = arith.truncf %155 : vector<8x32xf32> to vector<8x32xbf16>
    %c0_53 = arith.constant 0 : index
    %c0_54 = arith.constant 0 : index
    %c0_55 = arith.constant 0 : index
    %157 = vector.load %arg6[%c0_53, %c0_54, %c0_55] : memref<1x32x64xbf16, #tpu.memory_space<vmem>>, vector<1x32x64xbf16>
    %158 = vector.shape_cast %157 : vector<1x32x64xbf16> to vector<32x64xbf16>
    %cst_56 = arith.constant dense<0.000000e+00> : vector<8x64xf32>
    %159 = tpu.matmul %156, %158, %cst_56 {dimension_numbers = #tpu.dot_dimension_numbers<[1], [0], [0], [1], [0, 0, 1, 1], [], []>} : vector<8x32xbf16>, vector<32x64xbf16>, vector<8x64xf32> -> vector<8x64xf32>
    %160 = vector.broadcast %15 : vector<1x64xf32> to vector<8x64xf32>
    %161 = arith.addf %159, %160 : vector<8x64xf32>
    %cst_57 = arith.constant 0.000000e+00 : f32
    %162 = vector.broadcast %cst_57 : f32 to vector<8x64xf32>
    %163 = arith.maximumf %161, %162 : vector<8x64xf32>
    %164 = arith.truncf %163 : vector<8x64xf32> to vector<8x64xbf16>
    %c0_58 = arith.constant 0 : index
    %c0_59 = arith.constant 0 : index
    %c0_60 = arith.constant 0 : index
    %165 = vector.load %arg8[%c0_58, %c0_59, %c0_60] : memref<1x64x32xbf16, #tpu.memory_space<vmem>>, vector<1x64x32xbf16>
    %166 = vector.shape_cast %165 : vector<1x64x32xbf16> to vector<64x32xbf16>
    %cst_61 = arith.constant dense<0.000000e+00> : vector<8x32xf32>
    %167 = tpu.matmul %164, %166, %cst_61 {dimension_numbers = #tpu.dot_dimension_numbers<[1], [0], [0], [1], [0, 0, 1, 1], [], []>} : vector<8x64xbf16>, vector<64x32xbf16>, vector<8x32xf32> -> vector<8x32xf32>
    %168 = vector.broadcast %9 : vector<1x32xf32> to vector<8x32xf32>
    %169 = arith.addf %167, %168 : vector<8x32xf32>
    %170 = arith.addf %155, %169 : vector<8x32xf32>
    %cst_62 = arith.constant dense<0.000000e+00> : vector<8xf32>
    %171 = vector.multi_reduction <add>, %170, %cst_62 [1] : vector<8x32xf32> to vector<8xf32>
    %172 = vector.shape_cast %171 : vector<8xf32> to vector<8x1xf32>
    %cst_63 = arith.constant 3.200000e+01 : f32
    %173 = vector.broadcast %cst_63 : f32 to vector<8x1xf32>
    %174 = arith.divf %172, %173 : vector<8x1xf32>
    %175 = vector.broadcast %174 : vector<8x1xf32> to vector<8x32xf32>
    %176 = arith.subf %170, %175 : vector<8x32xf32>
    %177 = arith.mulf %176, %176 : vector<8x32xf32>
    %cst_64 = arith.constant dense<0.000000e+00> : vector<8xf32>
    %178 = vector.multi_reduction <add>, %177, %cst_64 [1] : vector<8x32xf32> to vector<8xf32>
    %179 = vector.shape_cast %178 : vector<8xf32> to vector<8x1xf32>
    %cst_65 = arith.constant 3.200000e+01 : f32
    %180 = vector.broadcast %cst_65 : f32 to vector<8x1xf32>
    %181 = arith.divf %179, %180 : vector<8x1xf32>
    %182 = vector.broadcast %174 : vector<8x1xf32> to vector<8x32xf32>
    %183 = arith.subf %170, %182 : vector<8x32xf32>
    %cst_66 = arith.constant 9.99999974E-6 : f32
    %184 = vector.broadcast %cst_66 : f32 to vector<8x1xf32>
    %185 = arith.addf %181, %184 : vector<8x1xf32>
    %186 = math.rsqrt %185 : vector<8x1xf32>
    %187 = vector.broadcast %186 : vector<8x1xf32> to vector<8x32xf32>
    %188 = arith.mulf %183, %187 : vector<8x32xf32>
    %189 = vector.broadcast %10 : vector<1x32xf32> to vector<8x32xf32>
    %190 = arith.mulf %188, %189 : vector<8x32xf32>
    %191 = vector.broadcast %11 : vector<1x32xf32> to vector<8x32xf32>
    %192 = arith.addf %190, %191 : vector<8x32xf32>
    %c0_67 = arith.constant 0 : index
    %c0_68 = arith.constant 0 : index
    %193 = vector.load %arg10[%c0_67, %c0_68] : memref<8x32xf32, #tpu.memory_space<vmem>>, vector<8x32xf32>
    tpu.vector_store %arg10[%c0_67, %c0_68], %192 {strides = array<i32>} : memref<8x32xf32, #tpu.memory_space<vmem>>, vector<8x32xf32>,
    return
  }
  func.func @transform_0(%arg0: i32, %arg1: i32) -> (i32, i32) {
    %c0_i32 = arith.constant 0 : i32
    %c0_i32_0 = arith.constant 0 : i32
    return %arg0, %c0_i32 : i32, i32
  }
  func.func @transform_1(%arg0: i32, %arg1: i32) -> (i32, i32, i32) {
    %c0_i32 = arith.constant 0 : i32
    %c0_i32_0 = arith.constant 0 : i32
    %c0_i32_1 = arith.constant 0 : i32
    return %arg1, %c0_i32, %c0_i32_0 : i32, i32, i32
  }
  func.func @transform_2(%arg0: i32, %arg1: i32) -> (i32, i32, i32) {
    %c0_i32 = arith.constant 0 : i32
    %c0_i32_0 = arith.constant 0 : i32
    %c0_i32_1 = arith.constant 0 : i32
    return %arg1, %c0_i32, %c0_i32_0 : i32, i32, i32
  }
  func.func @transform_3(%arg0: i32, %arg1: i32) -> (i32, i32, i32, i32) {
    %c0_i32 = arith.constant 0 : i32
    %c0_i32_0 = arith.constant 0 : i32
    %c0_i32_1 = arith.constant 0 : i32
    %c0_i32_2 = arith.constant 0 : i32
    return %arg1, %c0_i32, %c0_i32_0, %c0_i32_1 : i32, i32, i32, i32
  }
  func.func @transform_4(%arg0: i32, %arg1: i32) -> (i32, i32, i32) {
    %c0_i32 = arith.constant 0 : i32
    %c0_i32_0 = arith.constant 0 : i32
    %c0_i32_1 = arith.constant 0 : i32
    return %arg1, %c0_i32, %c0_i32_0 : i32, i32, i32
  }
  func.func @transform_5(%arg0: i32, %arg1: i32) -> (i32, i32, i32) {
    %c0_i32 = arith.constant 0 : i32
    %c0_i32_0 = arith.constant 0 : i32
    %c0_i32_1 = arith.constant 0 : i32
    return %arg1, %c0_i32, %c0_i32_0 : i32, i32, i32
  }
  func.func @transform_6(%arg0: i32, %arg1: i32) -> (i32, i32, i32) {
    %c0_i32 = arith.constant 0 : i32
    %c0_i32_0 = arith.constant 0 : i32
    %c0_i32_1 = arith.constant 0 : i32
    return %arg1, %c0_i32, %c0_i32_0 : i32, i32, i32
  }
  func.func @transform_7(%arg0: i32, %arg1: i32) -> (i32, i32, i32) {
    %c0_i32 = arith.constant 0 : i32
    %c0_i32_0 = arith.constant 0 : i32
    %c0_i32_1 = arith.constant 0 : i32
    return %arg1, %c0_i32, %c0_i32_0 : i32, i32, i32
  }
  func.func @transform_8(%arg0: i32, %arg1: i32) -> (i32, i32) {
    %c0_i32 = arith.constant 0 : i32
    %c0_i32_0 = arith.constant 0 : i32
    return %arg0, %c0_i32 : i32, i32
  }
}

</mosaic_0001>

<bundles_post_ra>
// kernel: tpu_custom_call.1
= control target key start
LH: loop header
LB: loop body
LE: loop exit
PB: predicated region body
PF: predicated region fallthrough
CT: control target
= control target key end

     0   :  { %s2393_s0 = inlined_call_operand.hbm [shape: f32[16,32], index: 0, kind: input, shape index: {}]   ;;  %s2394_s1 = inlined_call_operand.vmem [shape: bf16[2,32,96], index: 1, kind: input, shape index: {}]   ;;  %s2395_s2 = inlined_call_operand.vmem [shape: f32[2,1,96], index: 2, kind: input, shape index: {}]   ;;  %s2396_s3 = inlined_call_operand.vmem [shape: bf16[2,4,8,32], index: 3, kind: input, shape index: {}]   ;;  %s2397_s4 = inlined_call_operand.vmem [shape: bf16[2,32,64], index: 4, kind: input, shape index: {}]   ;;  %s2398_s5 = inlined_call_operand.vmem [shape: f32[2,1,64], index: 5, kind: input, shape index: {}]   ;;  %s2399_s6 = inlined_call_operand.vmem [shape: bf16[2,64,32], index: 6, kind: input, shape index: {}]   ;;  %s2400_s7 = inlined_call_operand.vmem [shape: f32[2,6,32], index: 7, kind: input, shape index: {}]   ;;  %s2401_s8 = inlined_call_operand.hbm [shape: f32[16,32], index: 8, kind: output, shape index: {}]  }
   0x1   :  { %2412 = sst [smem:[#allocation18_spill]] %s2393_s0 }
   0x2   :  { %2413 = sst [smem:[#allocation19_spill]] %s2394_s1 }
   0x3   :  { %2414 = sst [smem:[#allocation20_spill]] %s2401_s8 }
   0x4   :  { %13 = vsyncpa [#allocation3], 0 }
   0x5   :  { %15 = vsyncpa [#allocation3 + $0x1], 0 }
   0x6   :  { %16 = vsyncpa [#allocation4], 0 }
   0x7   :  { %18 = vsyncpa [#allocation4 + $0x1], 0  ;;  %s2048_s27 = smov 0   ;;  %s2050_s28 = smov 0  }
   0x8   :  { %s2052_s29 = smov 0   ;;  %s2054_s30 = smov 0  }
   0x9   :  { %s2056_s9 = smov 0   ;;  %s2058_s10 = smov 0  }
   0xa   :  { %s2060_s11 = smov 0   ;;  %s2062_s12 = smov 0  }
   0xb LB: > { %2415 = sst [smem:[#allocation8_spill]] %s1958_s27  ;;  %s1553_s13 = sadd.s32 4294967295, %s1986_s12   ;;  %s1986_s12 = sphi %s2062_s12, %s24_s12   ;;  %s1982_s11 = sphi %s2060_s11, %s2444_s11   ;;  %s1978_s10 = sphi %s2058_s10, %s2443_s10   ;;  %s1974_s9 = sphi %s2056_s9, %s2442_s9   ;;  %s1970_s30 = sphi %s2054_s30, %s2441_s30   ;;  %s1966_s29 = sphi %s2052_s29, %s2440_s29   ;;  %s1962_s28 = sphi %s2050_s28, %s2439_s28   ;;  %s1958_s27 = sphi %s2048_s27, %s2438_s27  }
   0xc   : > { %2416 = sst [smem:[#allocation9_spill]] %s1962_s28  ;;  %s1554_s14 = sadd.s32 4294967294, %s1986_s12  }
   0xd   : > { %2417 = sst [smem:[#allocation10_spill]] %s1966_s29  ;;  %s33_s15 = sadd.s32 1, %s1978_s10 }
   0xe   : > { %2418 = sst [smem:[#allocation11_spill]] %s1978_s10  ;;  %s36_s16 = sadd.s32 1, %s1982_s11 }
   0xf   : > { %2419 = sst [smem:[#allocation12_spill]] %s1982_s11  ;;  %p34_p0 = scmp.ge.s32.totalorder %s33_s15, 2 }
  0x10   : > { %2420 = sst [smem:[#allocation13_spill]] %s1986_s12  ;;  %s43_s17 = sadd.s32 1, %s1966_s29 }
  0x11   : > { %p50_p1 = scmp.ne.s32.totalorder %s1966_s29, %s1962_s28  ;;  %p51_p2 = scmp.eq.s32.totalorder %s1986_s12, 0 }
  0x12   : > { %s2446_s15 = smov (%p34_p0, %s33_s15), 0  ;;  %s2448_s16 = smov (!%p34_p0, %s36_s16), %s1982_s11 }
  0x13   : > { %2421 = sst [smem:[#allocation14_spill]] %s2446_s15  ;;  %p2099_p3 = por %p51_p2, %p50_p1 }
  0x14   : > { %p56_p4 = scmp.ne.s32.totalorder %s1962_s28, %s1958_s27  ;;  %p38_p5 = scmp.ge.s32.totalorder %s2448_s16, 2 }
  0x15   : > { %p57_p6 = scmp.eq.s32.totalorder %s1553_s13, 0  ;;  %p262_p7 = scmp.eq.s32.totalorder %s1553_s13, 3 }
  0x16   : > { %p268_p8 = scmp.eq.s32.totalorder %s1554_s14, 3  ;;  %s2450_s16 = smov (%p38_p5, %s2448_s16), 0 }
  0x17   : > { %2423 = sst [smem:[#allocation15_spill]] %s2450_s16  ;;  %p2107_p9 = por %p57_p6, %p56_p4 }
  0x18   : > { %p2111_p10 = por %p262_p7, %p50_p1  ;;  %s40_s21 = ssub.s32 %s1982_s11, %s2450_s16 }
  0x19   : > { %p2117_p11 = por %p268_p8, %p56_p4  ;;  %p41_p12 = scmp.eq.s32.totalorder %s40_s21, 0 }
  0x1a   : > { %p1755_p13 = scmp.lt.s32.totalorder %s1986_s12, 4  ;;  %s288_s23 = sand.u32 1, %s1966_s29  }
  0x1b   : > { %s2426_s22 = scalar_select %p2117_p11, 1, 0 }
  0x1c   : > { %s2124_s24 = scalar_select %p41_p12, %s1966_s29, %s43_s17  }
  0x1d   : > { %2427 = sst [smem:[#allocation16_spill]] %s2426_s22  ;;  %s1557_s25 = sshll.u32 %s288_s23, 3 }
  0x1e   : > { %2428 = sst [smem:[#allocation17_spill]] %s2124_s24  ;;  %s1558_s26 = sshll.u32 %s1982_s11, 7 }
  0x1f   : > { %s2429_s0 = sld [smem:[#allocation18_spill]]  ;;  %s292_s10 = scalar_lea.vmem [#allocation2], %s1557_s25 }
  0x20   : > { %s299_s27 = sshll.u32 %s292_s10, 4  ;;  %p2132_p0 = pnand %p1755_p13, %p2099_p3  ;;  %s300_s27 = int_to_ptr.vmem [resolvable:$true] %s299_s27 }
  0x21   : > { %p1559_p1 = scmp.ge.s32.totalorder %s1986_s12, 1  ;;  %p355_p2 = scmp.lt.s32.totalorder %s1986_s12, 5 }
  0x22   : > { %s289_s21 = scalar_lea.sflag [#allocation3], %s288_s23  ;;  %p1864_p4 = pneg %p2132_p0 }
  0x23   : > { %s1875_s17 = scalar_lea.vmem %s300_s27, 128  ;;  %s1988_s13 = smov [#allocation2]  }
  0x24   : > { %p1876_p5 = scmp.ne.s32.totalorder %s300_s27, %s1875_s17 }
  0x25   : > { %s297_s15 = scalar_lea.hbm %s2429_s0, %s1558_s26  ;;  %s1880_s26 = sshll.u32 %s1988_s13, 4  ;;  %s1881_s26 = int_to_ptr.vmem [resolvable:$false] %s1880_s26 }
  0x26   : > { %p1878_p6 = pnand %p1876_p5, %p1864_p4  ;;  %s1882_s10 = scalar_lea.vmem %s1881_s26, 256 }
  0x27   : > { %p1883_p8 = scmp.lt.s32.totalorder %s300_s27, %s1881_s26  ;;  %p1884_p12 = scmp.lt.s32.totalorder %s1882_s10, %s1875_s17 }
  0x28   : > { %p1879_p7 = pneg %p1878_p6 }
  0x29   : > { %p1885_p3 = por %p1884_p12, %p1883_p8 }
  0x2b   : > { %p1886_p13 = pnand %p1885_p3, %p1879_p7 }
  0x2d   : > { %1889 = shalt.err (!%p1886_p13)
}
  0x2e   : > { %1750 = dma.hbm_to_vmem [thread:$0]  (!%p2132_p0), %s297_s15, 128, %s300_s27, %s289_s21  }
  0x2f   : > { %p356_p11 = pnand %p1559_p1, %p355_p2 }
  0x30   : > { %s2147_s18 = sand.u32 (!%p356_p11), 1, %s1962_s28  }
  0x31   : > { %359 = sbr.rel (%p356_p11) target bundleno = 3563 (0xdeb), region = 52  ;;  %s1560_s23 = sshll.u32 (!%p356_p11), %s2147_s18, 3 }
  0x32   : > { %s362_s25 = scalar_lea.sflag (!%p356_p11), [#allocation3], %s2147_s18  ;;  %s365_s14 = scalar_lea.vmem (!%p356_p11), [#allocation2], %s1560_s23 }
  0x36   : > { %1949 = dma.done.wait (%p2107_p9), %s362_s25, 128  }
  0x37   : > { %1951 = vsyncadd (%p2107_p9), %s362_s25, 4294967168  ;;  %p428_p0 = scmp.lt.s32.totalorder %s1970_s30, 1  ;;  %s2431_s1 = sld [smem:[#allocation19_spill]] }
  0x38   : > { %p1571_p9 = scmp.ne.s32.totalorder %s1970_s30, 0 }
  0x39   : > { %s2157_s27 = scalar_select %p428_p0, %s1970_s30, 1 }
  0x3b   : > { %s1604_s15 = sshll.u32 %s2157_s27, 4  ;;  %s448_s12 = scalar_lea.vmem %s2398_s5, %s2157_s27 }
  0x3c   : > { %s2170_s0 = scalar_lea.vmem %s2396_s3, %s1604_s15  ;;  %s2175_s29 = scalar_lea.vmem %s2397_s4, %s1604_s15 }
  0x3d   : > { %s432_s19 = scalar_lea.vmem %s2431_s1, %s1604_s15  ;;  %s1607_s16 = sshll.u32 %s2157_s27, 5 }
  0x3e   : > { %s1570_s21 = sshll.u32 %s2157_s27, 3  ;;  %s2186_s13 = scalar_lea.vmem %s2399_s6, %s1607_s16 }
  0x3f   : > { %s2191_s25 = scalar_lea.vmem %s2400_s7, %s1570_s21  ;;  %s2193_s1 = scalar_lea.vmem [#allocation5], %s1560_s23 }
  0x40   : > { %462 = sbr.rel (%p1571_p9) target bundleno = 73 (0x49), region = 60 }
  0x45   : > { %v463_v0 = vld [vmem:[%s365_s14] sm:$0xff]  ;;  %vm465_vm0 = vcmask 261120  }
  0x46   : > { %v464_v1 = vmul.f32 5.656854, %v463_v0 }
  0x48   : > { %466 = vst.msk [vmem:[%s2193_s1] sm:$0xff] %vm465_vm0, %v464_v1 }
  0x49 PF: > { %v1834_v2 = vld [vmem:[%s432_s19 + $0x8] sm:$0xff]   ;;  %v1989_v3 = vmov 0.0   ;;  %v1835_v4 = vld [vmem:[%s432_s19] sm:$0xff]   ;;  %vm1990_vm1 = vmmov 0   ;;  %vm494_vm2 = vcmask 261120   ;;  %s2432_s30 = scalar_lea.vmem %s2395_s2, %s2157_s27  ;;  %s1991_s11 = smov 120  }
  0x4a   : > { %1643 = vmatprep.subr.bf16.mxu1 %v1989_v3  ;;  %1657 = vmatprep.subr.bf16.mxu0 %v1989_v3  ;;  %v1572_v7 = vld [vmem:[%s2432_s30] ss:$0 sm:$0xff]  ;;  %s1992_s22 = smov 96   ;;  %s1993_s24 = smov 88   ;;  %vm542_vm3 = vcmask 64512   ;;  %vm606_vm4 = vcmask 1043456  }
  0x4b   : > { %1644 = vmatpush3.bf16.msra.mxu1 %v1834_v2  ;;  %1647 = vmatprep.mubr.msk.bf16.mxu1 %vm1990_vm1, %v1989_v3  ;;  %s1994_s23 = smov 64   ;;  %s1995_s14 = smov 56   ;;  %v651_v51 = vld [vmem:[%s2170_s0] sm:$0xf]  ;;  %v1580_v53 = vld [vmem:[%s2170_s0 + $0x4] sm:$0xf] }
  0x4c   : > { %1645 = vmatprep.subr.bf16.mxu1 %v1989_v3  ;;  %1659 = vmatprep.mubr.msk.bf16.mxu0 %vm1990_vm1, %v1989_v3  ;;  %s1996_s15 = smov 112   ;;  %s1997_s17 = smov 80   ;;  %v815_v52 = vsel %vm606_vm4, %v651_v51, 0  ;;  %v769_v54 = vsel %vm606_vm4, %v1580_v53, 0  ;;  %vm1311_vm5 = vcmask 523264  }
  0x4d   : > { %s1998_s19 = smov 72   ;;  %s1999_s16 = smov 104  }
  0x4e   : > { %s2000_s21 = smov 48   ;;  %s2001_s26 = smov 40  }
  0x4f   : > { %v2202_v5 = vld [vmem:[%s2193_s1] sm:$0xff]  ;;  %1646 = vmatpush3.bf16.msra.mxu1 %v1835_v4  ;;  %s1394_s27 = sshll.u32 %s2193_s1, 4  ;;  %s1381_s28 = scalar_lea.sflag [#allocation4], %s2147_s18  ;;  %s1395_s27 = int_to_ptr.vmem [resolvable:$true] %s1394_s27 }
  0x50   : > { %v471_v6 = vpack.c.bf16 %v2202_v5, %v2202_v5  ;;  %1651 = vmatprep.subr.bf16.mxu1 %v1989_v3  ;;  %s1890_s30 = scalar_lea.vmem %s1395_s27, 128 }
  0x51   : > { %p1891_p11 = scmp.ne.s32.totalorder %s1395_s27, %s1890_s30 }
  0x52   : > { %1648 = vmatmul.mubr.msk.bf16.vlgmr.msra.gmra.mxu1 %vm494_vm2, %v471_v6 }
  0x53   : > { %1653 = vmatprep.mubr.msk.bf16.mxu1 %vm1990_vm1, %v1989_v3  ;;  %p1892_p1 = pnand %p1891_p11, %p2111_p10 }
  0x55   : > { %p1893_p2 = pneg %p1892_p1 }
 0x112   : > { %v532_v8 = vpop.f32.mrf.mxu1 }
 0x113   : > { %v533_v9 = vadd.f32 %v1572_v7, %v532_v8 }
 0x114   : > { %v1649_v10 = vpop.f32.mrf.mxu1 }
 0x115   : > { %v2218_v11 = vpack.c.bf16 %v533_v9, %v533_v9 }
 0x116   : > { %v535_v12 = vpop.f32.mrf.mxu1 }
 0x117   : > { %652 = vrot.lane.b32.xlu1 %v2218_v11, %s1991_s11  ;;  %540 = vrot.lane.b32.xlu0 %v2218_v11, %s1992_s22  ;;  %s2002_s11 = smov [#allocation5]  }
 0x118   : > { %v1650_v13 = vpop.f32.mrf.mxu1  ;;  %s1894_s22 = sshll.u32 %s2002_s11, 4  ;;  %s1895_s22 = int_to_ptr.vmem [resolvable:$false] %s1894_s22 }
 0x119   : > { %p1897_p4 = scmp.lt.s32.totalorder %s1395_s27, %s1895_s22 }
 0x11b   : > { %654 = vrot.lane.b32.xlu0 %v2218_v11, %s1993_s24 }
 0x189   : > { %v541_v14 = vpop.permute.xlu0 %540  ;;  %v653_v18 = vpop.permute.xlu1 %652 }
 0x18a   : > { %v547_v15 = vsel %vm542_vm3, %v541_v14, 0 }
 0x18b   : > { %1652 = vmatpush3.bf16.xpose.msra.mxu1 %v547_v15 }
 0x18c   : > { %1663 = vmatprep.subr.bf16.mxu1 %v1989_v3 }
 0x18d   : > { %v655_v16 = vpop.permute.xlu0 %654 }
 0x18e   : > { %v660_v17 = vsel %vm542_vm3, %v655_v16, 0 }
 0x192   : > { %1654 = vmatmul.mubr.msk.bf16.vlgmr.msra.gmra.mxu1 %vm542_vm3, %v2218_v11 }
 0x193   : > { %1664 = vmatpush3.bf16.xpose.msra.mxu1 %v660_v17  ;;  %1665 = vmatprep.mubr.msk.bf16.mxu1 %vm1990_vm1, %v1989_v3 }
 0x194   : > { %1675 = vmatprep.subr.bf16.mxu1 %v1989_v3 }
 0x19a   : > { %1666 = vmatmul.mubr.msk.bf16.vlgmr.msra.gmra.mxu1 %vm542_vm3, %v653_v18 }
 0x19b   : > { %1677 = vmatprep.mubr.msk.bf16.mxu1 %vm1990_vm1, %v1989_v3  ;;  %1676 = vmatpush3.bf16.msra.mxu1 %v769_v54 }
 0x19c   : > { %1687 = vmatprep.subr.bf16.mxu1 %v1989_v3 }
 0x252   : > { %v583_v19 = vpop.f32.mrf.mxu1 }
 0x253   : > { %v589_v20 = vsel %vm542_vm3, %v583_v19, -inf }
 0x254   : > { %590 = vmax.xlane.f32.xlu1 %v589_v20  ;;  %v1655_v21 = vpop.f32.mrf.mxu1 }
 0x256   : > { %v586_v22 = vpop.f32.mrf.mxu1 }
 0x258   : > { %v1656_v23 = vpop.f32.mrf.mxu1 }
 0x25a   : > { %v696_v24 = vpop.f32.mrf.mxu1 }
 0x25b   : > { %v702_v25 = vsel %vm542_vm3, %v696_v24, -inf }
 0x25c   : > { %703 = vmax.xlane.f32.xlu0 %v702_v25  ;;  %v1667_v26 = vpop.f32.mrf.mxu1 }
 0x25e   : > { %v699_v27 = vpop.f32.mrf.mxu1 }
 0x260   : > { %v1668_v28 = vpop.f32.mrf.mxu1 }
 0x2dd   : > { %v591_v29 = vpop.xlane.xlu1 %590 }
 0x2de   : > { %v592_v30 = vsub.f32 %v583_v19, %v591_v29 }
 0x2e0   : > { %v593_v31 = vmul.f32 1.442695, %v592_v30 }
 0x2e2   : > { %1842 = vpow2.f32 %v593_v31 }
 0x2e5   : > { %v704_v32 = vpop.xlane.xlu0 %703 }
 0x2e6   : > { %v705_v33 = vsub.f32 %v696_v24, %v704_v32 }
 0x2e8   : > { %v706_v34 = vmul.f32 1.442695, %v705_v33 }
 0x2ea   : > { %1844 = vpow2.f32 %v706_v34 }
 0x2ef   : > { %v1843_v35 = vpop.eup %1842 }
 0x2f0   : > { %v595_v36 = vsel %vm542_vm3, %v1843_v35, 0.0 }
 0x2f1   : > { %596 = vadd.xlane.f32.xlu0 %v595_v36 }
 0x2f7   : > { %v1845_v37 = vpop.eup %1844 }
 0x2f8   : > { %v708_v38 = vsel %vm542_vm3, %v1845_v37, 0.0 }
 0x2f9   : > { %709 = vadd.xlane.f32.xlu1 %v708_v38 }
 0x307   : > { %601 = vrot.lane.b32.xlu0 %v2218_v11, %s1994_s23 }
 0x30a   : > { %714 = vrot.lane.b32.xlu1 %v2218_v11, %s1995_s14 }
 0x30b   : > { %857 = vrot.lane.b32.xlu0 %v2218_v11, %s1996_s15 }
 0x30e   : > { %859 = vrot.lane.b32.xlu1 %v2218_v11, %s1997_s17 }
 0x37a   : > { %v597_v39 = vpop.xlane.xlu0 %596 }
 0x37b   : > { %1846 = vrcp.f32 %v597_v39 }
 0x37e   : > { %v602_v40 = vpop.permute.xlu0 %601 }
 0x37f   : > { %v608_v41 = vsel %vm606_vm4, %v602_v40, 0 }
 0x380   : > { %1658 = vmatpush3.bf16.msra.mxu0 %v608_v41 }
 0x381   : > { %1669 = vmatprep.subr.bf16.mxu0 %v1989_v3 }
 0x382   : > { %v710_v42 = vpop.xlane.xlu1 %709  ;;  %v858_v4 = vpop.permute.xlu0 %857 }
 0x383   : > { %1848 = vrcp.f32 %v710_v42 }
 0x386   : > { %v715_v45 = vpop.permute.xlu1 %714 }
 0x387   : > { %v720_v47 = vsel %vm606_vm4, %v715_v45, 0 }
 0x388   : > { %v1847_v43 = vpop.eup %1846 }
 0x389   : > { %v599_v44 = vmul.f32 %v1847_v43, %v1843_v35  ;;  %v1585_v35 = vld [vmem:[%s2170_s0 + $0x8] sm:$0xf] }
 0x38a   : > { %v860_v60 = vpop.permute.xlu1 %859  ;;  %v974_v36 = vsel %vm606_vm4, %v1585_v35, 0 }
 0x38b   : > { %v600_v46 = vpack.c.bf16 %v599_v44, %v599_v44  ;;  %v865_v0 = vsel %vm542_vm3, %v860_v60, 0 }
 0x38d   : > { %1660 = vmatmul.mubr.msk.bf16.vlgmr.msra.gmra.mxu0 %vm542_vm3, %v600_v46 }
 0x38e   : > { %1670 = vmatpush3.bf16.msra.mxu0 %v720_v47  ;;  %1671 = vmatprep.mubr.msk.bf16.mxu0 %vm1990_vm1, %v1989_v3 }
 0x38f   : > { %1681 = vmatprep.subr.bf16.mxu0 %v1989_v3 }
 0x390   : > { %v1849_v48 = vpop.eup %1848 }
 0x391   : > { %v712_v49 = vmul.f32 %v1849_v48, %v1845_v37 }
 0x393   : > { %v713_v50 = vpack.c.bf16 %v712_v49, %v712_v49 }
 0x395   : > { %1672 = vmatmul.mubr.msk.bf16.vlgmr.msra.gmra.mxu0 %vm542_vm3, %v713_v50 }
 0x396   : > { %1683 = vmatprep.mubr.msk.bf16.mxu0 %vm1990_vm1, %v1989_v3  ;;  %1682 = vmatpush3.bf16.msra.mxu0 %v815_v52 }
 0x397   : > { %1693 = vmatprep.subr.bf16.mxu0 %v1989_v3 }
 0x44d   : > { %v644_v55 = vpop.f32.mrf.mxu0 }
 0x44e   : > { %v650_v56 = vpack.c.bf16 %v644_v55, %v644_v55  ;;  %v1589_v55 = vld [vmem:[%s2170_s0 + $0xc] sm:$0xf] }
 0x44f   : > { %v1661_v57 = vpop.f32.mrf.mxu0 }
 0x450   : > { %1684 = vmatmul.mubr.msk.bf16.vlgmr.msra.gmra.mxu0 %vm542_vm3, %v650_v56 }
 0x451   : > { %v647_v58 = vpop.f32.mrf.mxu0  ;;  %1695 = vmatprep.mubr.msk.bf16.mxu0 %vm1990_vm1, %v1989_v3 }
 0x453   : > { %v1662_v59 = vpop.f32.mrf.mxu0 }
 0x455   : > { %v756_v61 = vpop.f32.mrf.mxu0 }
 0x456   : > { %v762_v62 = vpack.c.bf16 %v756_v61, %v756_v61 }
 0x457   : > { %v1673_v63 = vpop.f32.mrf.mxu0 }
 0x458   : > { %1678 = vmatmul.mubr.msk.bf16.vlgmr.msra.gmra.mxu1 %vm542_vm3, %v762_v62 }
 0x459   : > { %1688 = vmatpush3.bf16.xpose.msra.mxu1 %v865_v0  ;;  %v759_v1 = vpop.f32.mrf.mxu0  ;;  %1689 = vmatprep.mubr.msk.bf16.mxu1 %vm1990_vm1, %v1989_v3 }
 0x45a   : > { %1699 = vmatprep.subr.bf16.mxu1 %v1989_v3 }
 0x45b   : > { %v1674_v2 = vpop.f32.mrf.mxu0 }
 0x460   : > { %1690 = vmatmul.mubr.msk.bf16.vlgmr.msra.gmra.mxu1 %vm542_vm3, %v858_v4 }
 0x461   : > { %1701 = vmatprep.mubr.msk.bf16.mxu1 %vm1990_vm1, %v1989_v3  ;;  %1700 = vmatpush3.bf16.msra.mxu1 %v974_v36 }
 0x462   : > { %1711 = vmatprep.subr.bf16.mxu1 %v1989_v3 }
 0x510   : > { %v851_v6 = vpop.f32.mrf.mxu0 }
 0x512   : > { %v1685_v7 = vpop.f32.mrf.mxu0 }
 0x513   : > { %v1177_v7 = vlaneseq }
 0x514   : > { %v854_v8 = vpop.f32.mrf.mxu0 }
 0x515   : > { %v2307_v8 = vshrl.u32 %v1177_v7, 7 }
 0x516   : > { %v1686_v9 = vpop.f32.mrf.mxu0 }
 0x517   : > { %v1179_v9 = vsub.s32 0, %v2307_v8 }
 0x518   : > { %v805_v10 = vpop.f32.mrf.mxu1 }
 0x519   : > { %v2269_v12 = vadd.f32 %v851_v6, %v805_v10  ;;  %v2311_v10 = vld [vmem:[%s2191_s25] sm:$0x3f]  ;;  %s2433_s25 = sld [smem:[#allocation20_spill]] }
 0x51a   : > { %v1679_v13 = vpop.f32.mrf.mxu1 }
 0x51c   : > { %v808_v14 = vpop.f32.mrf.mxu1 }
 0x51e   : > { %v1680_v15 = vpop.f32.mrf.mxu1 }
 0x520   : > { %v901_v16 = vpop.f32.mrf.mxu1 }
 0x521   : > { %v907_v17 = vsel %vm542_vm3, %v901_v16, -inf }
 0x522   : > { %908 = vmax.xlane.f32.xlu1 %v907_v17  ;;  %v1691_v18 = vpop.f32.mrf.mxu1 }
 0x524   : > { %v904_v19 = vpop.f32.mrf.mxu1 }
 0x526   : > { %v1692_v20 = vpop.f32.mrf.mxu1 }
 0x533   : > { %1019 = vrot.lane.b32.xlu1 %v2218_v11, %s1998_s19 }
 0x537   : > { %1017 = vrot.lane.b32.xlu1 %v2218_v11, %s1999_s16 }
 0x5ab   : > { %v909_v21 = vpop.xlane.xlu1 %908 }
 0x5ac   : > { %v910_v22 = vsub.f32 %v901_v16, %v909_v21 }
 0x5ae   : > { %v911_v23 = vmul.f32 1.442695, %v910_v22 }
 0x5af   : > { %v1020_v31 = vpop.permute.xlu1 %1019 }
 0x5b0   : > { %1850 = vpow2.f32 %v911_v23  ;;  %v1025_v33 = vsel %vm542_vm3, %v1020_v31, 0 }
 0x5b3   : > { %v1018_v34 = vpop.permute.xlu1 %1017 }
 0x5bd   : > { %v1851_v24 = vpop.eup %1850 }
 0x5be   : > { %v913_v25 = vsel %vm542_vm3, %v1851_v24, 0.0 }
 0x5bf   : > { %914 = vadd.xlane.f32.xlu0 %v913_v25 }
 0x5d5   : > { %919 = vrot.lane.b32.xlu0 %v2218_v11, %s2000_s21 }
 0x648   : > { %v915_v26 = vpop.xlane.xlu0 %914 }
 0x649   : > { %1852 = vrcp.f32 %v915_v26  ;;  %v1836_v26 = vld [vmem:[%s2175_s29 + $0x8] sm:$0xff]  }
 0x64c   : > { %v920_v27 = vpop.permute.xlu0 %919 }
 0x64d   : > { %v925_v28 = vsel %vm606_vm4, %v920_v27, 0  ;;  %v1837_v27 = vld [vmem:[%s2175_s29] sm:$0xff]  }
 0x64e   : > { %1694 = vmatpush3.bf16.msra.mxu0 %v925_v28  ;;  %v1838_v28 = vld [vmem:[%s2186_s13 + $0x18] sm:$0xff]  }
 0x64f   : > { %1705 = vmatprep.subr.bf16.mxu0 %v1989_v3 }
 0x656   : > { %v1853_v29 = vpop.eup %1852 }
 0x657   : > { %v917_v30 = vmul.f32 %v1853_v29, %v1851_v24 }
 0x659   : > { %v918_v32 = vpack.c.bf16 %v917_v30, %v917_v30 }
 0x65b   : > { %1696 = vmatmul.mubr.msk.bf16.vlgmr.msra.gmra.mxu0 %vm542_vm3, %v918_v32  ;;  %v1199_v32 = vsub.s32 1, %v2307_v8 }
 0x65c   : > { %1706 = vmatpush3.bf16.xpose.msra.mxu0 %v1025_v33  ;;  %1707 = vmatprep.mubr.msk.bf16.mxu0 %vm1990_vm1, %v1989_v3  ;;  %v1204_v33 = vsub.s32 2, %v2307_v8 }
 0x65d   : > { %1717 = vmatprep.subr.bf16.mxu0 %v1989_v3 }
 0x663   : > { %1708 = vmatmul.mubr.msk.bf16.vlgmr.msra.gmra.mxu0 %vm542_vm3, %v1018_v34  ;;  %v1200_v34 = vrot.slane %v2311_v10, %v1199_v32 }
 0x664   : > { %1719 = vmatprep.mubr.msk.bf16.mxu0 %vm1990_vm1, %v1989_v3 }
 0x71b   : > { %v961_v37 = vpop.f32.mrf.mxu0 }
 0x71c   : > { %v967_v38 = vpack.c.bf16 %v961_v37, %v961_v37  ;;  %v1205_v37 = vrot.slane %v2311_v10, %v1204_v33 }
 0x71d   : > { %v1697_v39 = vpop.f32.mrf.mxu0 }
 0x71e   : > { %1702 = vmatmul.mubr.msk.bf16.vlgmr.msra.gmra.mxu1 %vm542_vm3, %v967_v38 }
 0x71f   : > { %v964_v40 = vpop.f32.mrf.mxu0  ;;  %1713 = vmatprep.mubr.msk.bf16.mxu1 %vm1990_vm1, %v1989_v3 }
 0x721   : > { %v1698_v41 = vpop.f32.mrf.mxu0 }
 0x722   : > { %v1840_v41 = vld [vmem:[%s2186_s13 + $0x8] sm:$0xff]  }
 0x723   : > { %v1061_v42 = vpop.f32.mrf.mxu0 }
 0x724   : > { %v1067_v43 = vsel %vm542_vm3, %v1061_v42, -inf }
 0x725   : > { %1068 = vmax.xlane.f32.xlu0 %v1067_v43  ;;  %v1709_v44 = vpop.f32.mrf.mxu0  ;;  %v1591_v43 = vld [vmem:[%s448_s12] ss:$0 sm:$0xff]  ;;  %s1601_s12 = sshll.u32 %s1974_s9, 7  ;;  %s1896_s9 = scalar_lea.vmem %s1895_s22, 256 }
 0x726   : > { %s1392_s8 = scalar_lea.hbm %s2433_s25, %s1601_s12  ;;  %p1898_p5 = scmp.lt.s32.totalorder %s1896_s9, %s1890_s30 }
 0x727   : > { %v1064_v45 = vpop.f32.mrf.mxu0 }
 0x728   : > { %p1899_p6 = por %p1898_p5, %p1897_p4 }
 0x729   : > { %v1710_v46 = vpop.f32.mrf.mxu0 }
 0x72a   : > { %p1900_p7 = pnand %p1899_p6, %p1893_p2 }
 0x73b   : > { %1079 = vrot.lane.b32.xlu0 %v2218_v11, %s2001_s26  ;;  %v1134_v11 = vsel %vm606_vm4, %v1589_v55, 0 }
 0x73c   : > { %1718 = vmatpush3.bf16.msra.mxu0 %v1134_v11 }
 0x73d   : > { %1731 = vmatprep.subr.bf16.mxu0 %v1989_v3 }
 0x7ae   : > { %v1069_v47 = vpop.xlane.xlu0 %1068 }
 0x7af   : > { %v1070_v48 = vsub.f32 %v1061_v42, %v1069_v47  ;;  %v1841_v42 = vld [vmem:[%s2186_s13] sm:$0xff]  }
 0x7b1   : > { %v1071_v49 = vmul.f32 1.442695, %v1070_v48 }
 0x7b2   : > { %v1080_v50 = vpop.permute.xlu0 %1079 }
 0x7b3   : > { %1854 = vpow2.f32 %v1071_v49  ;;  %v1085_v51 = vsel %vm606_vm4, %v1080_v50, 0 }
 0x7b4   : > { %1712 = vmatpush3.bf16.msra.mxu1 %v1085_v51  ;;  %v1285_v51 = vsub.s32 3, %v2307_v8 }
 0x7b5   : > { %1723 = vmatprep.subr.bf16.mxu1 %v1989_v3 }
 0x7c0   : > { %v1855_v52 = vpop.eup %1854 }
 0x7c1   : > { %v1073_v53 = vsel %vm542_vm3, %v1855_v52, 0.0 }
 0x7c2   : > { %1074 = vadd.xlane.f32.xlu1 %v1073_v53 }
 0x7de   : > { %v1010_v54 = vpop.f32.mrf.mxu1 }
 0x7df   : > { %v1016_v56 = vadd.f32 %v1010_v54, %v2269_v12  ;;  %v1180_v12 = vrot.slane %v2311_v10, %v1179_v9 }
 0x7e0   : > { %v1703_v57 = vpop.f32.mrf.mxu1 }
 0x7e2   : > { %v1013_v58 = vpop.f32.mrf.mxu1 }
 0x7e4   : > { %v1704_v59 = vpop.f32.mrf.mxu1 }
 0x84b   : > { %v1075_v60 = vpop.xlane.xlu1 %1074 }
 0x84c   : > { %1856 = vrcp.f32 %v1075_v60 }
 0x859   : > { %v1857_v61 = vpop.eup %1856 }
 0x85a   : > { %v1077_v62 = vmul.f32 %v1857_v61, %v1855_v52 }
 0x85c   : > { %v1078_v63 = vpack.c.bf16 %v1077_v62, %v1077_v62 }
 0x85e   : > { %1714 = vmatmul.mubr.msk.bf16.vlgmr.msra.gmra.mxu1 %vm542_vm3, %v1078_v63 }
 0x85f   : > { %1727 = vmatprep.mubr.msk.bf16.mxu1 %vm1990_vm1, %v1989_v3  ;;  %1724 = vmatpush3.bf16.msra.mxu1 %v1836_v26 }
 0x860   : > { %1725 = vmatprep.subr.bf16.mxu1 %v1989_v3 }
 0x863   : > { %1726 = vmatpush3.bf16.msra.mxu1 %v1837_v27 }
 0x91e   : > { %v1121_v0 = vpop.f32.mrf.mxu1 }
 0x91f   : > { %v1127_v1 = vpack.c.bf16 %v1121_v0, %v1121_v0 }
 0x920   : > { %v1715_v2 = vpop.f32.mrf.mxu1 }
 0x921   : > { %1720 = vmatmul.mubr.msk.bf16.vlgmr.msra.gmra.mxu0 %vm542_vm3, %v1127_v1  ;;  %v1371_v2 = vsub.s32 4, %v2307_v8 }
 0x922   : > { %v1124_v4 = vpop.f32.mrf.mxu1  ;;  %1739 = vmatprep.mubr.msk.bf16.mxu0 %vm1990_vm1, %v1989_v3  ;;  %1732 = vmatpush3.bf16.msra.mxu0 %v1838_v28 }
 0x923   : > { %1733 = vmatprep.subr.bf16.mxu0 %v1989_v3  ;;  %v1376_v4 = vsub.s32 5, %v2307_v8 }
 0x924   : > { %v1716_v6 = vpop.f32.mrf.mxu1 }
 0x925   : > { %v1372_v6 = vrot.slane %v2311_v10, %v1371_v2 }
 0x9e1   : > { %v1170_v13 = vpop.f32.mrf.mxu0 }
 0x9e2   : > { %v1176_v14 = vadd.f32 %v1170_v13, %v1016_v56 }
 0x9e3   : > { %v1721_v15 = vpop.f32.mrf.mxu0 }
 0x9e4   : > { %v1181_v16 = vadd.f32 %v1180_v12, %v1176_v14  ;;  %v1377_v12 = vrot.slane %v2311_v10, %v1376_v4 }
 0x9e5   : > { %v1173_v17 = vpop.f32.mrf.mxu0 }
 0x9e6   : > { %v1182_v18 = vadd.f32 %v1181_v16, %v2202_v5  ;;  %v1839_v5 = vld [vmem:[%s2186_s13 + $0x10] sm:$0xff]  }
 0x9e7   : > { %v1722_v19 = vpop.f32.mrf.mxu0  ;;  %1734 = vmatpush3.bf16.msra.mxu0 %v1839_v5 }
 0x9e8   : > { %v1183_v20 = vsel %vm494_vm2, %v1182_v18, 0.0  ;;  %1735 = vmatprep.subr.bf16.mxu0 %v1989_v3 }
 0x9e9   : > { %1184 = vadd.xlane.f32.xlu1 %v1183_v20 }
 0x9eb   : > { %1736 = vmatpush3.bf16.msra.mxu0 %v1840_v41 }
 0x9ec   : > { %1737 = vmatprep.subr.bf16.mxu0 %v1989_v3  ;;  %v1286_v3 = vrot.slane %v2311_v10, %v1285_v51 }
 0x9ef   : > { %1738 = vmatpush3.bf16.msra.mxu0 %v1841_v42 }
 0xa72   : > { %v1185_v21 = vpop.xlane.xlu1 %1184 }
 0xa73   : > { %v1187_v22 = vmul.f32 0.03125, %v1185_v21 }
 0xa75   : > { %v1188_v23 = vsub.f32 %v1182_v18, %v1187_v22 }
 0xa77   : > { %v1189_v24 = vmul.f32 %v1188_v23, %v1188_v23 }
 0xa79   : > { %v1190_v25 = vsel %vm494_vm2, %v1189_v24, 0.0 }
 0xa7a   : > { %1191 = vadd.xlane.f32.xlu1 %v1190_v25 }
 0xb03   : > { %v1192_v29 = vpop.xlane.xlu1 %1191 }
 0xb04   : > { %v1193_v30 = vmul.f32 0.03125, %v1192_v29 }
 0xb06   : > { %v1194_v31 = vadd.f32 1e-05, %v1193_v30 }
 0xb08   : > { %1858 = vrsqrt.f32 %v1194_v31 }
 0xb15   : > { %v1859_v35 = vpop.eup %1858 }
 0xb16   : > { %v1196_v36 = vmul.f32 %v1859_v35, %v1188_v23 }
 0xb18   : > { %v1201_v38 = vmul.f32 %v1200_v34, %v1196_v36 }
 0xb1a   : > { %v1206_v39 = vadd.f32 %v1205_v37, %v1201_v38 }
 0xb1c   : > { %v1207_v40 = vpack.c.bf16 %v1206_v39, %v1206_v39 }
 0xb1e   : > { %1728 = vmatmul.mubr.msk.bf16.vlgmr.msra.gmra.mxu1 %vm494_vm2, %v1207_v40 }
 0xbde   : > { %v1267_v44 = vpop.f32.mrf.mxu1 }
 0xbdf   : > { %v1268_v45 = vadd.f32 %v1591_v43, %v1267_v44 }
 0xbe0   : > { %v1729_v46 = vpop.f32.mrf.mxu1 }
 0xbe1   : > { %v1273_v47 = vmax.f32 %v1268_v45, 0.0 }
 0xbe2   : > { %v1270_v48 = vpop.f32.mrf.mxu1 }
 0xbe3   : > { %v1274_v49 = vpack.c.bf16 %v1273_v47, %v1273_v47 }
 0xbe4   : > { %v1730_v50 = vpop.f32.mrf.mxu1 }
 0xbe5   : > { %1740 = vmatmul.mubr.msk.bf16.vlgmr.msra.gmra.mxu0 %vm1311_vm5, %v1274_v49 }
 0xca5   : > { %v1349_v52 = vpop.f32.mrf.mxu0 }
 0xca6   : > { %v1350_v53 = vadd.f32 %v1349_v52, %v1286_v3 }
 0xca7   : > { %v1741_v54 = vpop.f32.mrf.mxu0 }
 0xca8   : > { %v1355_v55 = vadd.f32 %v1350_v53, %v1206_v39 }
 0xca9   : > { %v1352_v56 = vpop.f32.mrf.mxu0 }
 0xcaa   : > { %v1356_v11 = vsel %vm494_vm2, %v1355_v55, 0.0 }
 0xcab   : > { %1357 = vadd.xlane.f32.xlu1 %v1356_v11  ;;  %v1742_v57 = vpop.f32.mrf.mxu0 }
 0xd34   : > { %v1358_v58 = vpop.xlane.xlu1 %1357 }
 0xd35   : > { %v1359_v59 = vmul.f32 0.03125, %v1358_v58 }
 0xd37   : > { %v1360_v60 = vsub.f32 %v1355_v55, %v1359_v59 }
 0xd39   : > { %v1361_v61 = vmul.f32 %v1360_v60, %v1360_v60 }
 0xd3b   : > { %v1362_v62 = vsel %vm494_vm2, %v1361_v61, 0.0 }
 0xd3c   : > { %1363 = vadd.xlane.f32.xlu1 %v1362_v62 }
 0xdc5   : > { %v1364_v63 = vpop.xlane.xlu1 %1363 }
 0xdc6   : > { %v1365_v0 = vmul.f32 0.03125, %v1364_v63 }
 0xdc8   : > { %v1366_v1 = vadd.f32 1e-05, %v1365_v0 }
 0xdca   : > { %1860 = vrsqrt.f32 %v1366_v1 }
 0xdd7   : > { %v1861_v7 = vpop.eup %1860 }
 0xdd8   : > { %v1368_v9 = vmul.f32 %v1861_v7, %v1360_v60 }
 0xdda   : > { %v1373_v13 = vmul.f32 %v1372_v6, %v1368_v9 }
 0xddc   : > { %v1378_v14 = vadd.f32 %v1377_v12, %v1373_v13 }
 0xdde   : > { %1379 = vst.msk [vmem:[%s2193_s1] sm:$0xff] %vm494_vm2, %v1378_v14 }
 0xddf   : > { %1903 = shalt.err (!%p1900_p7)
}
 0xde0   : > { %s1904_s24 = scalar_lea.hbm %s1392_s8, 128  ;;  %s1908_s23 = scalar_lea.hbm %s2433_s25, 256 }
 0xde1   : > { %p1905_p8 = scmp.ne.s32.totalorder %s1392_s8, %s1904_s24  ;;  %p1909_p13 = scmp.lt.s32.totalorder %s1392_s8, %s2433_s25 }
 0xde2   : > { %p1910_p0 = scmp.lt.s32.totalorder %s1908_s23, %s1904_s24 }
 0xde3   : > { %p1906_p12 = pnand %p1905_p8, %p2111_p10 }
 0xde4   : > { %p1911_p9 = por %p1910_p0, %p1909_p13 }
 0xde5   : > { %p1907_p3 = pneg %p1906_p12 }
 0xde7   : > { %p1912_p11 = pnand %p1911_p9, %p1907_p3 }
 0xde9   : > { %1915 = shalt.err (!%p1912_p11)
}
 0xdea   : > { %1745 = dma.vmem_to_hbm [thread:$0]  (%p2111_p10), %s1395_s27, 128, %s1392_s8, %s1381_s28  }
 0xdeb PF: > { %s2434_s17 = sld [smem:[#allocation13_spill]] }
 0xdec   : > { %s2435_s19 = sld [smem:[#allocation8_spill]] }
 0xded   : > { %s2436_s16 = sld [smem:[#allocation16_spill]] }
 0xdf1   : > { %p1756_p1 = scmp.ge.s32.totalorder %s2434_s17, 2 }
 0xdf2   : > { %s1406_s21 = sand.u32 1, %s2435_s19  }
 0xdf3   : > { %p2437_p2 = scmp.ne.s32.totalorder %s2436_s16, 0  ;;  %s1407_s26 = scalar_lea.sflag [#allocation4], %s1406_s21 }
 0xdf5   : > { %p1752_p4 = pnand %p1756_p1, %p2437_p2 }
 0xdf7   : > { %p1753_p5 = pneg %p1752_p4 }
 0xdf9   : > { %1953 = dma.done.wait (%p1753_p5), %s1407_s26, 128  }
 0xdfa   : > { %1955 = vsyncadd (%p1753_p5), %s1407_s26, 4294967168  ;;  %s24_s12 = sadd.s32 1, %s2434_s17   ;;  %s2438_s27 = sld [smem:[#allocation9_spill]] }
 0xdfb   : > { %p21_p6 = scmp.ge.s32.totalorder %s24_s12, 6   ;;  %s2439_s28 = sld [smem:[#allocation10_spill]] }
 0xdfc   : > { %s2440_s29 = sld [smem:[#allocation17_spill]] }
 0xdfd   : > { %s2441_s30 = sld [smem:[#allocation11_spill]]  ;;  %23 = sbr.rel (!%p21_p6) target bundleno = 11 (0xb), region = 125 }
 0xdfe   : > { %s2442_s9 = sld [smem:[#allocation12_spill]] }
 0xdff   : > { %s2443_s10 = sld [smem:[#allocation14_spill]] }
 0xe00   : > { %s2444_s11 = sld [smem:[#allocation15_spill]] }
 0xe02   :  { %1412 = vsyncpa [#allocation3], 1 }
 0xe03   :  { %1414 = vsyncpa [#allocation3 + $0x1], 1 }
 0xe04   :  { %1415 = vsyncpa [#allocation4], 1 }
 0xe05   :  { %1417 = vsyncpa [#allocation4 + $0x1], 1 }

</bundles_post_ra>
